<compile_context>
chip_gen: v6e
topology: v6e:2x2x1
jax: 0.10.0
libtpu: 0.0.40
codegen_flags: <defaults>
</compile_context>

<pallas_src>
import jax
import jax.numpy as jnp
from jax.experimental import pallas as pl
from jax.experimental.pallas import tpu as pltpu


def _round_up(a, b):
    return (a + b - 1) // b * b


def _ceil_div(a, b):
    return (a + b - 1) // b


# --------------------------------------------------------------------------
# Kernel: one (hidden-tile j, batch-tile i) output block, full K per block.
# --------------------------------------------------------------------------
def ligru_cell_kernel(x_ref, hbf_ref, hf_ref, wx_ref, wh_ref, b_ref, out_ref):
    """
    x_ref  : (TB, Ip)      bf16   padded input rows
    hbf_ref: (TB, Hp)      bf16   padded previous hidden state (matmul operand)
    hf_ref : (TB, TN)      f32    previous hidden state slice (blend operand)
    wx_ref : (Ip, 2*TN)    bf16   fused [Wxz_j | Wxh_j] weight block
    wh_ref : (Hp, 2*TN)    bf16   fused [Whz_j | Whh_j] weight block
    b_ref  : (1,  2*TN)    f32    fused [bz_j  | bh_j ] bias block
    out_ref: (TB, TN)      f32
    """
    tn = out_ref.shape[1]

    # Two wide MXU pushes (N = 2*TN >= 256), f32 accumulation in registers.
    acc = (
        jnp.dot(x_ref[...], wx_ref[...], preferred_element_type=jnp.float32)
        + jnp.dot(hbf_ref[...], wh_ref[...], preferred_element_type=jnp.float32)
        + b_ref[...]
    )

    # sigmoid(a) = 1 / (1 + exp(-a)); divide goes to the EUP slot.
    z = pl.reciprocal(1.0 + jnp.exp(-acc[:, :tn]), approx=True)
    h_cand = jnp.maximum(acc[:, tn:], 0.0)

    h = hf_ref[...]
    # (1 - z) * h + z * h_cand  ==  h + z * (h_cand - h)
    out_ref[...] = (h + z * (h_cand - h)).astype(out_ref.dtype)


# --------------------------------------------------------------------------
# Parameter packing (done once, outside the per-step call)
# --------------------------------------------------------------------------
def pack_params(params, input_size, hidden_size):
    """Pad, fuse and per-tile-interleave the weights/biases for the kernel.

    Column layout of the fused arrays (width 2*Hp): for each hidden tile j of
    width TN -> [z columns of tile j | h-candidate columns of tile j].
    """
    I, H = input_size, hidden_size
    Ip = _round_up(I, 128)
    Hp = _round_up(H, 128)
    # TN=128 unless Hp is a >=2-tile multiple of 256, so the hidden grid axis
    # has >= 2 entries whenever Hp >= 256 (v7x megacore stays busy).
    TN = 256 if (Hp % 256 == 0 and Hp >= 512) else 128
    nt = Hp // TN
    f32 = jnp.float32

    def pad(w, rows_p):
        out = jnp.zeros((rows_p, Hp), f32)
        return out.at[: w.shape[0], :H].set(w.astype(f32))

    wxz = pad(params["wxz"], Ip)            # (Ip, Hp)
    wxh = pad(params["wxh"], Ip)            # (Ip, Hp)
    whz = pad(params["whz"], Hp)            # (Hp, Hp)
    whh = pad(params["whh"], Hp)            # (Hp, Hp)
    bz = jnp.zeros((1, Hp), f32).at[:, :H].set(params["bz"].astype(f32))
    bh = jnp.zeros((1, Hp), f32).at[:, :H].set(params["bh"].astype(f32))

    def interleave(wz, wh_, rows):
        return jnp.concatenate(
            [wz.reshape(rows, nt, 1, TN), wh_.reshape(rows, nt, 1, TN)], axis=2
        ).reshape(rows, 2 * Hp)

    return {
        "wx_fused": interleave(wxz, wxh, Ip).astype(jnp.bfloat16),
        "wh_fused": interleave(whz, whh, Hp).astype(jnp.bfloat16),
        "b_fused": interleave(bz, bh, 1),   # f32
        "I": I, "H": H, "Ip": Ip, "Hp": Hp, "TN": TN,
    }


def _vmem_limit_bytes():
    """Chip-aware scoped VMEM limit (leave headroom for compiler scratch)."""
    try:
        cap = int(pltpu.get_tpu_info().vmem_capacity_bytes)
    except Exception:
        cap = 64 * 1024 * 1024          # conservative (v7x-sized) fallback
    return min(int(cap * 3 // 4), 96 * 1024 * 1024)


# --------------------------------------------------------------------------
# Wrapper
# --------------------------------------------------------------------------
def ligru_cell(x, h, packed):
    """x: (B, I) f32, h: (B, H) f32 -> (B, H) f32."""
    B, I = x.shape
    H = h.shape[1]
    assert I == packed["I"] and H == packed["H"]
    Ip, Hp, TN = packed["Ip"], packed["Hp"], packed["TN"]

    # Batch tiling: multiple of 16 (bf16 sublane packing), minimal padding.
    n_bt = max(1, _ceil_div(B, 256))
    TB = _round_up(_ceil_div(B, n_bt), 16)
    Bp = TB * n_bt

    # Pad/cast activations directly (no [x|h] f32 slab, no extra bf16 pass).
    x_bf = jnp.zeros((Bp, Ip), jnp.bfloat16).at[:B, :I].set(x.astype(jnp.bfloat16))
    h_bf = jnp.zeros((Bp, Hp), jnp.bfloat16).at[:B, :H].set(h.astype(jnp.bfloat16))
    h_f = jnp.zeros((Bp, Hp), jnp.float32).at[:B, :H].set(h.astype(jnp.float32))

    # Grid = (hidden tiles, batch tiles); batch innermost so the weight block
    # (index_map independent of i) stays VMEM-resident across batch tiles.
    grid = (Hp // TN, Bp // TB)

    out_p = pl.pallas_call(
        ligru_cell_kernel,
        out_shape=jax.ShapeDtypeStruct((Bp, Hp), jnp.float32),
        grid_spec=pltpu.PrefetchScalarGridSpec(
            num_scalar_prefetch=0,
            grid=grid,
            in_specs=[
                pl.BlockSpec((TB, Ip), lambda j, i: (i, 0)),        # x   (bf16)
                pl.BlockSpec((TB, Hp), lambda j, i: (i, 0)),        # h   (bf16)
                pl.BlockSpec((TB, TN), lambda j, i: (i, j)),        # h   (f32)
                pl.BlockSpec((Ip, 2 * TN), lambda j, i: (0, j)),    # Wx fused
                pl.BlockSpec((Hp, 2 * TN), lambda j, i: (0, j)),    # Wh fused
                pl.BlockSpec((1, 2 * TN), lambda j, i: (0, j)),     # bias fused
            ],
            out_specs=pl.BlockSpec((TB, TN), lambda j, i: (i, j)),
        ),
        compiler_params=pltpu.CompilerParams(
            dimension_semantics=("parallel", "parallel"),
            vmem_limit_bytes=_vmem_limit_bytes(),
        ),
    )(x_bf, h_bf, h_f, packed["wx_fused"], packed["wh_fused"], packed["b_fused"])

    return out_p[:B, :H]


# --------------------------------------------------------------------------
# Init + pure-JAX reference (mirrors the PyTorch module)
# --------------------------------------------------------------------------
def init_params(key, input_size, hidden_size, dtype=jnp.float32):
    """nn.Linear-style uniform(-1/sqrt(fan_in), +1/sqrt(fan_in)) init.

    Weights are stored transposed, i.e. (in_features, out_features).
    """
    ks = jax.random.split(key, 6)
    si = 1.0 / jnp.sqrt(jnp.asarray(input_size, dtype))
    sh = 1.0 / jnp.sqrt(jnp.asarray(hidden_size, dtype))
    return {
        "wxz": jax.random.uniform(ks[0], (input_size, hidden_size), dtype, -si, si),
        "whz": jax.random.uniform(ks[1], (hidden_size, hidden_size), dtype, -sh, sh),
        "bz":  jax.random.uniform(ks[2], (1, hidden_size), dtype, -si, si),
        "wxh": jax.random.uniform(ks[3], (input_size, hidden_size), dtype, -si, si),
        "whh": jax.random.uniform(ks[4], (hidden_size, hidden_size), dtype, -sh, sh),
        "bh":  jax.random.uniform(ks[5], (1, hidden_size), dtype, -si, si),
    }


def ligru_cell_ref(x, h, p):
    """Pure-JAX f32 reference."""
    z = jax.nn.sigmoid(x @ p["wxz"] + h @ p["whz"] + p["bz"])
    hc = jnp.maximum(x @ p["wxh"] + h @ p["whh"] + p["bh"], 0.0)
    return (1.0 - z) * h + z * hc


def _run_and_check(key, B, I, H):
    kx, kh, kp = jax.random.split(key, 3)
    x = jax.random.normal(kx, (B, I), jnp.float32)
    h = jax.random.normal(kh, (B, H), jnp.float32)
    params = init_params(kp, I, H)
    packed = pack_params(params, I, H)

    out = jax.block_until_ready(ligru_cell(x, h, packed))
    ref = jax.block_until_ready(ligru_cell_ref(x, h, params))
    assert out.shape == (B, H)
    # bf16 matmul inputs with f32 accumulation -> ~1e-3 level differences.
    assert jnp.allclose(out, ref, atol=2e-2, rtol=2e-2), (
        f"mismatch (B={B}, I={I}, H={H}); "
        f"max abs diff {float(jnp.max(jnp.abs(out - ref)))}"
    )


# --------------------------------------------------------------------------
if __name__ == "__main__":
    key = jax.random.PRNGKey(0)
    k1, k2 = jax.random.split(key, 2)

    # Small shape matching the module's intended use.
    _run_and_check(k1, B=8, I=16, H=32)
    # Multi-hidden-tile shape (exercises the per-tile weight interleave and
    # the (j, i) index maps).
    _run_and_check(k2, B=24, I=72, H=160)

    print("KERNEL_OK")
</pallas_src>

<mosaic_0001>
module attributes {stable_mosaic.version = 11 : i64} {
  func.func @ligru_cell_kernel(%arg0: i32, %arg1: i32, %arg2: memref<16x128xbf16, #tpu.memory_space<vmem>>, %arg3: memref<16x128xbf16, #tpu.memory_space<vmem>>, %arg4: memref<16x128xf32, #tpu.memory_space<vmem>>, %arg5: memref<128x256xbf16, #tpu.memory_space<vmem>>, %arg6: memref<128x256xbf16, #tpu.memory_space<vmem>>, %arg7: memref<1x256xf32, #tpu.memory_space<vmem>>, %arg8: memref<16x128xf32, #tpu.memory_space<vmem>>) attributes {dimension_semantics = [#tpu.dimension_semantics<parallel>, #tpu.dimension_semantics<parallel>], iteration_bounds = array<i64: 1, 1>, scalar_prefetch = 0 : i64, scratch_operands = 0 : i64, tpu.core_type = #tpu.core_type<tc>, window_params = [{transform_indices = @transform_0, window_bounds = array<i64: 16, 128>}, {transform_indices = @transform_1, window_bounds = array<i64: 16, 128>}, {transform_indices = @transform_2, window_bounds = array<i64: 16, 128>}, {transform_indices = @transform_3, window_bounds = array<i64: 128, 256>}, {transform_indices = @transform_4, window_bounds = array<i64: 128, 256>}, {transform_indices = @transform_5, window_bounds = array<i64: 1, 256>}, {transform_indices = @transform_6, window_bounds = array<i64: 16, 128>}]} {
    %c0 = arith.constant 0 : index
    %c0_0 = arith.constant 0 : index
    %0 = vector.load %arg2[%c0, %c0_0] : memref<16x128xbf16, #tpu.memory_space<vmem>>, vector<16x128xbf16>
    %c0_1 = arith.constant 0 : index
    %c0_2 = arith.constant 0 : index
    %1 = vector.load %arg5[%c0_1, %c0_2] : memref<128x256xbf16, #tpu.memory_space<vmem>>, vector<128x256xbf16>
    %cst = arith.constant dense<0.000000e+00> : vector<16x256xf32>
    %2 = tpu.matmul %0, %1, %cst {dimension_numbers = #tpu.dot_dimension_numbers<[1], [0], [0], [1], [0, 0, 1, 1], [], []>} : vector<16x128xbf16>, vector<128x256xbf16>, vector<16x256xf32> -> vector<16x256xf32>
    %c0_3 = arith.constant 0 : index
    %c0_4 = arith.constant 0 : index
    %3 = vector.load %arg3[%c0_3, %c0_4] : memref<16x128xbf16, #tpu.memory_space<vmem>>, vector<16x128xbf16>
    %c0_5 = arith.constant 0 : index
    %c0_6 = arith.constant 0 : index
    %4 = vector.load %arg6[%c0_5, %c0_6] : memref<128x256xbf16, #tpu.memory_space<vmem>>, vector<128x256xbf16>
    %cst_7 = arith.constant dense<0.000000e+00> : vector<16x256xf32>
    %5 = tpu.matmul %3, %4, %cst_7 {dimension_numbers = #tpu.dot_dimension_numbers<[1], [0], [0], [1], [0, 0, 1, 1], [], []>} : vector<16x128xbf16>, vector<128x256xbf16>, vector<16x256xf32> -> vector<16x256xf32>
    %6 = arith.addf %2, %5 : vector<16x256xf32>
    %c0_8 = arith.constant 0 : index
    %c0_9 = arith.constant 0 : index
    %7 = vector.load %arg7[%c0_8, %c0_9] : memref<1x256xf32, #tpu.memory_space<vmem>>, vector<1x256xf32>
    %8 = vector.broadcast %7 : vector<1x256xf32> to vector<16x256xf32>
    %9 = arith.addf %6, %8 : vector<16x256xf32>
    %10 = vector.extract_strided_slice %9 {offsets = [0, 0], sizes = [16, 128], strides = [1, 1]} : vector<16x256xf32> to vector<16x128xf32>
    %cst_10 = arith.constant 0.000000e+00 : f32
    %11 = vector.broadcast %cst_10 : f32 to vector<16x128xf32>
    %12 = arith.subf %11, %10 : vector<16x128xf32>
    %13 = math.exp %12 : vector<16x128xf32>
    %cst_11 = arith.constant 1.000000e+00 : f32
    %14 = vector.broadcast %cst_11 : f32 to vector<16x128xf32>
    %15 = arith.addf %14, %13 : vector<16x128xf32>
    %16 = tpu.reciprocal %15 {approx = true} : vector<16x128xf32> -> vector<16x128xf32>
    %17 = vector.extract_strided_slice %9 {offsets = [0, 128], sizes = [16, 128], strides = [1, 1]} : vector<16x256xf32> to vector<16x128xf32>
    %cst_12 = arith.constant 0.000000e+00 : f32
    %18 = vector.broadcast %cst_12 : f32 to vector<16x128xf32>
    %19 = arith.maximumf %17, %18 : vector<16x128xf32>
    %c0_13 = arith.constant 0 : index
    %c0_14 = arith.constant 0 : index
    %20 = vector.load %arg4[%c0_13, %c0_14] : memref<16x128xf32, #tpu.memory_space<vmem>>, vector<16x128xf32>
    %21 = arith.subf %19, %20 : vector<16x128xf32>
    %22 = arith.mulf %16, %21 : vector<16x128xf32>
    %23 = arith.addf %20, %22 : vector<16x128xf32>
    %c0_15 = arith.constant 0 : index
    %c0_16 = arith.constant 0 : index
    %24 = vector.load %arg8[%c0_15, %c0_16] : memref<16x128xf32, #tpu.memory_space<vmem>>, vector<16x128xf32>
    tpu.vector_store %arg8[%c0_15, %c0_16], %23 {strides = array<i32>} : memref<16x128xf32, #tpu.memory_space<vmem>>, vector<16x128xf32>,
    return
  }
  func.func @transform_0(%arg0: i32, %arg1: i32) -> (i32, i32) {
    %c0_i32 = arith.constant 0 : i32
    %c0_i32_0 = arith.constant 0 : i32
    return %arg1, %c0_i32 : i32, i32
  }
  func.func @transform_1(%arg0: i32, %arg1: i32) -> (i32, i32) {
    %c0_i32 = arith.constant 0 : i32
    %c0_i32_0 = arith.constant 0 : i32
    return %arg1, %c0_i32 : i32, i32
  }
  func.func @transform_2(%arg0: i32, %arg1: i32) -> (i32, i32) {
    %c0_i32 = arith.constant 0 : i32
    return %arg1, %arg0 : i32, i32
  }
  func.func @transform_3(%arg0: i32, %arg1: i32) -> (i32, i32) {
    %c0_i32 = arith.constant 0 : i32
    %c0_i32_0 = arith.constant 0 : i32
    return %c0_i32, %arg0 : i32, i32
  }
  func.func @transform_4(%arg0: i32, %arg1: i32) -> (i32, i32) {
    %c0_i32 = arith.constant 0 : i32
    %c0_i32_0 = arith.constant 0 : i32
    return %c0_i32, %arg0 : i32, i32
  }
  func.func @transform_5(%arg0: i32, %arg1: i32) -> (i32, i32) {
    %c0_i32 = arith.constant 0 : i32
    %c0_i32_0 = arith.constant 0 : i32
    return %c0_i32, %arg0 : i32, i32
  }
  func.func @transform_6(%arg0: i32, %arg1: i32) -> (i32, i32) {
    %c0_i32 = arith.constant 0 : i32
    return %arg1, %arg0 : i32, i32
  }
}

</mosaic_0001>

<bundles_post_ra>
// kernel: tpu_custom_call.1
= control target key start
LH: loop header
LB: loop body
LE: loop exit
PB: predicated region body
PF: predicated region fallthrough
CT: control target
= control target key end

     0   :  { %11 = vsyncpa [#allocation3], 0  ;;  %s754_s0 = inlined_call_operand.hbm [shape: bf16[16,128], index: 0, kind: input, shape index: {}]   ;;  %s755_s1 = inlined_call_operand.hbm [shape: bf16[16,128], index: 1, kind: input, shape index: {}]   ;;  %s756_s2 = inlined_call_operand.hbm [shape: f32[16,128], index: 2, kind: input, shape index: {}]   ;;  %s757_s3 = inlined_call_operand.hbm [shape: bf16[128,256], index: 3, kind: input, shape index: {}]   ;;  %s758_s4 = inlined_call_operand.hbm [shape: bf16[128,256], index: 4, kind: input, shape index: {}]   ;;  %s759_s5 = inlined_call_operand.vmem [shape: f32[1,256], index: 5, kind: input, shape index: {}]   ;;  %s760_s6 = inlined_call_operand.hbm [shape: f32[16,128], index: 6, kind: output, shape index: {}]  }
   0x1   :  { %12 = vsyncpa [#allocation6], 0 }
   0x2   :  { %13 = vsyncpa [#allocation9], 0 }
   0x3   :  { %14 = vsyncpa [#allocation4], 0  ;;  %s675_s21 = smov [#allocation5]  }
   0x4   :  { %s32_s22 = sshll.u32 %s675_s21, 4  ;;  %s33_s22 = int_to_ptr.vmem [resolvable:$true] %s32_s22 }
   0x5   :  { %s555_s23 = scalar_lea.vmem %s33_s22, 128  ;;  %p560_p1 = scmp.lt.s32.totalorder %s33_s22, %s33_s22 }
   0x6   :  { %p556_p0 = scmp.ne.s32.totalorder %s33_s22, %s555_s23  ;;  %p561_p2 = scmp.lt.s32.totalorder %s555_s23, %s555_s23 }
   0x8   :  { %p562_p3 = por %p561_p2, %p560_p1 }
   0xa   :  { %p563_p4 = pnand %p562_p3, %p556_p0 }
   0xc   :  { %566 = shalt.err (!%p563_p4)
}
   0xd   :  { %s676_s24 = smov 64   ;;  %s677_s25 = smov 4  }
   0xe   :  { %38 = dma.hbm_to_vmem [thread:$0]  %s755_s1, 128, %s33_s22, [#allocation6], %s676_s24, %s676_s24, %s677_s25  }
   0xf   :  { %s678_s28 = smov [#allocation8]   ;;  %s679_s30 = smov [#allocation2]  }
  0x10   :  { %s56_s29 = sshll.u32 %s678_s28, 4  ;;  %s20_s7 = sshll.u32 %s679_s30, 4  ;;  %s57_s29 = int_to_ptr.vmem [resolvable:$true] %s56_s29  ;;  %s21_s7 = int_to_ptr.vmem [resolvable:$true] %s20_s7 }
  0x11   :  { %s575_s8 = scalar_lea.vmem %s57_s29, 2048  ;;  %p580_p6 = scmp.lt.s32.totalorder %s57_s29, %s57_s29 }
  0x12   :  { %p576_p5 = scmp.ne.s32.totalorder %s57_s29, %s575_s8  ;;  %p581_p7 = scmp.lt.s32.totalorder %s575_s8, %s575_s8 }
  0x14   :  { %p582_p8 = por %p581_p7, %p580_p6 }
  0x16   :  { %p583_p9 = pnand %p582_p8, %p576_p5 }
  0x18   :  { %586 = shalt.err (!%p583_p9)
}
  0x19   :  { %s680_s9 = smov 128   ;;  %s681_s10 = smov 8  }
  0x1a   :  { %62 = dma.hbm_to_vmem [thread:$0]  %s757_s3, 2048, %s57_s29, [#allocation9], %s680_s9, %s680_s9, %s681_s10  }
  0x1b   :  { %s595_s1 = scalar_lea.vmem %s21_s7, 128  ;;  %p600_p11 = scmp.lt.s32.totalorder %s21_s7, %s21_s7 }
  0x1c   :  { %p596_p10 = scmp.ne.s32.totalorder %s21_s7, %s595_s1  ;;  %p601_p12 = scmp.lt.s32.totalorder %s595_s1, %s595_s1 }
  0x1e   :  { %p602_p13 = por %p601_p12, %p600_p11 }
  0x20   :  { %p603_p0 = pnand %p602_p13, %p596_p10 }
  0x22   :  { %606 = shalt.err (!%p603_p0)
}
  0x23   :  { %26 = dma.hbm_to_vmem [thread:$0]  %s754_s0, 128, %s21_s7, [#allocation3], %s676_s24, %s676_s24, %s677_s25  }
  0x24   :  { %s682_s15 = smov [#allocation7]   ;;  %s683_s17 = smov [#allocation10]  }
  0x25   :  { %s44_s16 = sshll.u32 %s682_s15, 4  ;;  %s68_s18 = sshll.u32 %s683_s17, 4  ;;  %s45_s16 = int_to_ptr.vmem [resolvable:$true] %s44_s16  ;;  %s69_s18 = int_to_ptr.vmem [resolvable:$true] %s68_s18 }
  0x26   :  { %s615_s19 = scalar_lea.vmem %s45_s16, 256  ;;  %p620_p2 = scmp.lt.s32.totalorder %s45_s16, %s45_s16 }
  0x27   :  { %p616_p1 = scmp.ne.s32.totalorder %s45_s16, %s615_s19  ;;  %p621_p3 = scmp.lt.s32.totalorder %s615_s19, %s615_s19 }
  0x29   :  { %p622_p4 = por %p621_p3, %p620_p2 }
  0x2b   :  { %p623_p5 = pnand %p622_p4, %p616_p1 }
  0x2d   :  { %626 = shalt.err (!%p623_p5)
}
  0x2e   :  { %50 = dma.hbm_to_vmem [thread:$0]  %s756_s2, 256, %s45_s16, [#allocation6], %s680_s9, %s680_s9, %s681_s10  }
  0x2f   :  { %s635_s0 = scalar_lea.vmem %s69_s18, 2048  ;;  %p640_p7 = scmp.lt.s32.totalorder %s69_s18, %s69_s18 }
  0x30   :  { %p636_p6 = scmp.ne.s32.totalorder %s69_s18, %s635_s0  ;;  %p641_p8 = scmp.lt.s32.totalorder %s635_s0, %s635_s0 }
  0x32   :  { %p642_p9 = por %p641_p8, %p640_p7 }
  0x34   :  { %p643_p10 = pnand %p642_p9, %p636_p6 }
  0x36   :  { %646 = shalt.err (!%p643_p10)
}
  0x37   :  { %74 = dma.hbm_to_vmem [thread:$0]  %s758_s4, 2048, %s69_s18, [#allocation9], %s680_s9, %s680_s9, %s681_s10  }
  0x38   :  { %667 = dma.done.wait [#allocation3], 128  }
  0x39   :  { %668 = vsyncadd [#allocation3], 4294967168 }
  0x3a   :  { %669 = dma.done.wait [#allocation6], 384  }
  0x3b   :  { %670 = vsyncadd [#allocation6], 4294966912 }
  0x3c   :  { %671 = dma.done.wait [#allocation9], 4096  }
  0x3d   :  { %672 = vsyncadd [#allocation9], 4294963200  ;;  %v684_v0 = vmov 0   ;;  %v489_v1 = vld [vmem:[#allocation10 + $0x74] ss:$8 sps:$4 sm:$0xff]   ;;  %v537_v33 = vld [vmem:[#allocation5] sm:$0xff]   ;;  %v389_v35 = vlaneseq }
  0x3e   :  { %247 = vmatprep.mubr.bf16.mxu0 %v684_v0  ;;  %376 = vmatprep.mubr.bf16.mxu1 %v684_v0  ;;  %v491_v2 = vld [vmem:[#allocation8 + $0x74] ss:$8 sps:$4 sm:$0xff]   ;;  %v493_v3 = vld [vmem:[#allocation10 + $0x70] ss:$8 sps:$4 sm:$0xff]   ;;  %v495_v5 = vld [vmem:[#allocation10 + $0x64] ss:$8 sps:$4 sm:$0xff]  }
  0x3f   :  { %215 = vmatprep.subr.bf16.mxu0 %v489_v1  ;;  %v494_v4 = vld [vmem:[#allocation8 + $0x70] ss:$8 sps:$4 sm:$0xff]   ;;  %344 = vmatprep.subr.bf16.mxu1 %v491_v2  ;;  %v497_v6 = vld [vmem:[#allocation8 + $0x64] ss:$8 sps:$4 sm:$0xff]   ;;  %v499_v7 = vld [vmem:[#allocation10 + $0x60] ss:$8 sps:$4 sm:$0xff]  }
  0x40   :  { %216 = vmatpush1.bf16.msra.mxu0 %v493_v3  ;;  %345 = vmatpush1.bf16.msra.mxu1 %v494_v4  ;;  %v500_v8 = vld [vmem:[#allocation8 + $0x60] ss:$8 sps:$4 sm:$0xff]   ;;  %v501_v9 = vld [vmem:[#allocation10 + $0x54] ss:$8 sps:$4 sm:$0xff]   ;;  %v505_v11 = vld [vmem:[#allocation10 + $0x50] ss:$8 sps:$4 sm:$0xff]  }
  0x41   :  { %217 = vmatprep.subr.bf16.mxu0 %v495_v5  ;;  %346 = vmatprep.subr.bf16.mxu1 %v497_v6  ;;  %v503_v10 = vld [vmem:[#allocation8 + $0x54] ss:$8 sps:$4 sm:$0xff]   ;;  %v506_v12 = vld [vmem:[#allocation8 + $0x50] ss:$8 sps:$4 sm:$0xff]   ;;  %v507_v13 = vld [vmem:[#allocation10 + $0x44] ss:$8 sps:$4 sm:$0xff]  }
  0x42   :  { %v509_v14 = vld [vmem:[#allocation8 + $0x44] ss:$8 sps:$4 sm:$0xff]   ;;  %v511_v15 = vld [vmem:[#allocation10 + $0x40] ss:$8 sps:$4 sm:$0xff]   ;;  %v513_v17 = vld [vmem:[#allocation10 + $0x34] ss:$8 sps:$4 sm:$0xff]  }
  0x43   :  { %v512_v16 = vld [vmem:[#allocation8 + $0x40] ss:$8 sps:$4 sm:$0xff]   ;;  %v515_v18 = vld [vmem:[#allocation8 + $0x34] ss:$8 sps:$4 sm:$0xff]   ;;  %v517_v19 = vld [vmem:[#allocation10 + $0x30] ss:$8 sps:$4 sm:$0xff]  }
  0x44   :  { %218 = vmatpush1.bf16.msra.mxu0 %v499_v7  ;;  %347 = vmatpush1.bf16.msra.mxu1 %v500_v8  ;;  %v518_v20 = vld [vmem:[#allocation8 + $0x30] ss:$8 sps:$4 sm:$0xff]   ;;  %v519_v21 = vld [vmem:[#allocation10 + $0x24] ss:$8 sps:$4 sm:$0xff]   ;;  %v523_v23 = vld [vmem:[#allocation10 + $0x20] ss:$8 sps:$4 sm:$0xff]  }
  0x45   :  { %219 = vmatprep.subr.bf16.mxu0 %v501_v9  ;;  %348 = vmatprep.subr.bf16.mxu1 %v503_v10  ;;  %v521_v22 = vld [vmem:[#allocation8 + $0x24] ss:$8 sps:$4 sm:$0xff]   ;;  %v524_v24 = vld [vmem:[#allocation8 + $0x20] ss:$8 sps:$4 sm:$0xff]   ;;  %v525_v25 = vld [vmem:[#allocation10 + $0x14] ss:$8 sps:$4 sm:$0xff]  }
  0x46   :  { %v527_v26 = vld [vmem:[#allocation8 + $0x14] ss:$8 sps:$4 sm:$0xff]   ;;  %v529_v27 = vld [vmem:[#allocation10 + $0x10] ss:$8 sps:$4 sm:$0xff]   ;;  %v531_v29 = vld [vmem:[#allocation10 + $0x4] ss:$8 sps:$4 sm:$0xff]  }
  0x47   :  { %v530_v28 = vld [vmem:[#allocation8 + $0x10] ss:$8 sps:$4 sm:$0xff]   ;;  %v533_v30 = vld [vmem:[#allocation8 + $0x4] ss:$8 sps:$4 sm:$0xff]   ;;  %v535_v31 = vld [vmem:[#allocation10] ss:$8 sps:$4 sm:$0xff]  }
  0x48   :  { %220 = vmatpush1.bf16.msra.mxu0 %v505_v11  ;;  %349 = vmatpush1.bf16.msra.mxu1 %v506_v12  ;;  %v536_v32 = vld [vmem:[#allocation8] ss:$8 sps:$4 sm:$0xff]   ;;  %v390_v36 = vshrl.u32 %v389_v35, 7  ;;  %v415_v3 = vld [vmem:[#allocation7] sm:$0xff]  ;;  %v416_v7 = vld [vmem:[#allocation7 + $0x8] sm:$0xff] }
  0x49   :  { %221 = vmatprep.subr.bf16.mxu0 %v507_v13  ;;  %350 = vmatprep.subr.bf16.mxu1 %v509_v14  ;;  %v538_v34 = vld [vmem:[#allocation2] sm:$0xff]  }
  0x4a   :  { %v391_v37 = vsub.s32 0, %v390_v36  ;;  %v387_v38 = vld [vmem:[%s759_s5] sm:$0x3]  ;;  %v395_v54 = vsub.s32 1, %v390_v36  ;;  %s685_s5 = smov [#allocation11]  }
  0x4b   :  { %s430_s23 = sshll.u32 %s685_s5, 4  ;;  %s431_s23 = int_to_ptr.vmem [resolvable:$true] %s430_s23 }
  0x4c   :  { %222 = vmatpush1.bf16.msra.mxu0 %v511_v15  ;;  %351 = vmatpush1.bf16.msra.mxu1 %v512_v16  ;;  %v392_v39 = vrot.slane %v387_v38, %v391_v37  ;;  %v396_v58 = vrot.slane %v387_v38, %v395_v54  ;;  %s647_s24 = scalar_lea.vmem %s431_s23, 256  ;;  %p652_p12 = scmp.lt.s32.totalorder %s431_s23, %s431_s23 }
  0x4d   :  { %223 = vmatprep.subr.bf16.mxu0 %v513_v17  ;;  %352 = vmatprep.subr.bf16.mxu1 %v515_v18  ;;  %p648_p11 = scmp.ne.s32.totalorder %s431_s23, %s647_s24  ;;  %p653_p13 = scmp.lt.s32.totalorder %s647_s24, %s647_s24 }
  0x4f   :  { %p654_p0 = por %p653_p13, %p652_p12 }
  0x50   :  { %224 = vmatpush1.bf16.msra.mxu0 %v517_v19  ;;  %353 = vmatpush1.bf16.msra.mxu1 %v518_v20 }
  0x51   :  { %225 = vmatprep.subr.bf16.mxu0 %v519_v21  ;;  %354 = vmatprep.subr.bf16.mxu1 %v521_v22  ;;  %p655_p1 = pnand %p654_p0, %p648_p11 }
  0x54   :  { %226 = vmatpush1.bf16.msra.mxu0 %v523_v23  ;;  %355 = vmatpush1.bf16.msra.mxu1 %v524_v24 }
  0x55   :  { %227 = vmatprep.subr.bf16.mxu0 %v525_v25  ;;  %356 = vmatprep.subr.bf16.mxu1 %v527_v26 }
  0x58   :  { %228 = vmatpush1.bf16.msra.mxu0 %v529_v27  ;;  %357 = vmatpush1.bf16.msra.mxu1 %v530_v28 }
  0x59   :  { %229 = vmatprep.subr.bf16.mxu0 %v531_v29  ;;  %358 = vmatprep.subr.bf16.mxu1 %v533_v30 }
  0x5c   :  { %230 = vmatpush1.bf16.msra.mxu0 %v535_v31  ;;  %359 = vmatpush1.bf16.msra.mxu1 %v536_v32 }
  0x5f   :  { %248 = vmatmul.mubr.bf16.vlgmr.msra.gmra.mxu0 %v537_v33  ;;  %377 = vmatmul.mubr.bf16.vlgmr.msra.gmra.mxu1 %v538_v34 }
 0x11f   :  { %v249_v40 = vpop.f32.mrf.mxu0  ;;  %v378_v41 = vpop.f32.mrf.mxu1 }
 0x120   :  { %v379_v42 = vadd.f32 %v378_v41, %v249_v40 }
 0x121   :  { %v251_v43 = vpop.f32.mrf.mxu0  ;;  %v380_v44 = vpop.f32.mrf.mxu1 }
 0x122   :  { %v399_v45 = vadd.f32 %v392_v39, %v379_v42  ;;  %v381_v57 = vadd.f32 %v380_v44, %v251_v43 }
 0x123   :  { %v253_v46 = vpop.f32.mrf.mxu0  ;;  %v382_v47 = vpop.f32.mrf.mxu1 }
 0x124   :  { %v403_v48 = vsub.f32 0.0, %v399_v45  ;;  %v383_v49 = vadd.f32 %v382_v47, %v253_v46  ;;  %v400_v63 = vadd.f32 %v396_v58, %v381_v57 }
 0x125   :  { %v255_v60 = vpop.f32.mrf.mxu0  ;;  %v384_v61 = vpop.f32.mrf.mxu1 }
 0x126   :  { %v405_v50 = vmul.f32 1.442695, %v403_v48  ;;  %v401_v51 = vadd.f32 %v392_v39, %v383_v49  ;;  %v385_v0 = vadd.f32 %v384_v61, %v255_v60  ;;  %v413_v1 = vmax.f32 %v400_v63, 0.0 }
 0x128   :  { %539 = vpow2.f32 %v405_v50  ;;  %v404_v52 = vsub.f32 0.0, %v401_v51  ;;  %v402_v2 = vadd.f32 %v396_v58, %v385_v0  ;;  %v417_v4 = vsub.f32 %v413_v1, %v415_v3 }
 0x12a   :  { %v407_v53 = vmul.f32 1.442695, %v404_v52  ;;  %v414_v5 = vmax.f32 %v402_v2, 0.0 }
 0x12c   :  { %541 = vpow2.f32 %v407_v53  ;;  %v418_v9 = vsub.f32 %v414_v5, %v416_v7 }
 0x135   :  { %v540_v55 = vpop.eup %539 }
 0x136   :  { %v409_v56 = vadd.f32 1.0, %v540_v55 }
 0x138   :  { %543 = vrcp.f32 %v409_v56 }
 0x139   :  { %v542_v59 = vpop.eup %541 }
 0x13a   :  { %v410_v62 = vadd.f32 1.0, %v542_v59 }
 0x13c   :  { %545 = vrcp.f32 %v410_v62 }
 0x145   :  { %v544_v6 = vpop.eup %543 }
 0x146   :  { %v419_v8 = vmul.f32 %v544_v6, %v417_v4 }
 0x148   :  { %v421_v10 = vadd.f32 %v419_v8, %v415_v3 }
 0x149   :  { %v546_v11 = vpop.eup %545 }
 0x14a   :  { %v420_v12 = vmul.f32 %v546_v11, %v418_v9  ;;  %423 = vst [vmem:[#allocation11] sm:$0xff] %v421_v10 }
 0x14c   :  { %v422_v13 = vadd.f32 %v420_v12, %v416_v7 }
 0x14e   :  { %424 = vst [vmem:[#allocation11 + $0x8] sm:$0xff] %v422_v13 }
 0x14f   :  { %658 = shalt.err (!%p655_p1)
}
 0x150   :  { %436 = dma.vmem_to_hbm [thread:$0]  %s431_s23, 256, %s760_s6, [#allocation4], %s680_s9, %s680_s9, %s681_s10  }
 0x151   :  { %673 = dma.done.wait [#allocation4], 256  }
 0x152   :  { %674 = vsyncadd [#allocation4], 4294967040 }
 0x153   :  { %440 = vsyncpa [#allocation3], 1 }
 0x154   :  { %441 = vsyncpa [#allocation6], 1 }
 0x155   :  { %442 = vsyncpa [#allocation9], 1 }
 0x156   :  { %443 = vsyncpa [#allocation4], 1 }

</bundles_post_ra>
